<compile_context>
chip_gen: v7x
topology: tpu7x:2x2x1
jax: 0.10.0
libtpu: 0.0.40
codegen_flags: <defaults>
</compile_context>

<pallas_src>
import jax
import jax.numpy as jnp
from jax.experimental import pallas as pl
from jax.experimental.pallas import tpu as pltpu


def node_kernel(x_ref, h0_ref,
                w0h_ref, w0x_ref, b0_ref,
                w1_ref, b1_ref,
                w2_ref, b2_ref,
                wro_ref, bro_ref,
                out_ref):
    B, T, D_in = x_ref.shape
    L = h0_ref.shape[1]
    H = w0h_ref.shape[1]
    O = wro_ref.shape[1]

    # One-time hoisted weight loads. Fold the 0.1 Euler scale into layer 2 and
    # pre-broadcast the per-step biases so the unrolled loop carries no
    # per-iteration broadcast_in_dim / extra vmul on the dependent chain.
    W0h = w0h_ref[...]
    W1 = w1_ref[...]
    B1 = jnp.broadcast_to(b1_ref[...], (B, H))
    W2s = 0.1 * w2_ref[...]
    B2s = jnp.broadcast_to(0.1 * b2_ref[...], (B, L))

    # Recurrence-independent half of layer 0 for ALL timesteps as ONE matmul,
    # kept as an SSA value (stays in registers after the full unroll).
    x_flat = x_ref[...].reshape(B * T, D_in)
    xw0 = (jnp.dot(x_flat, w0x_ref[...], preferred_element_type=jnp.float32)
           + b0_ref[...]).reshape(B, T, H)

    # Fully-unrolled Euler recurrence; h carried as an SSA f32 value.
    h = h0_ref[...]
    h_list = []
    for t in range(T):                       # T static -> full unroll, static slices
        # layer 0: Linear(latent+input -> hidden) + ReLU
        #   concat([h, x]) @ W0 == h @ W0h + (x @ W0x + b0), latter precomputed.
        z = jnp.dot(h, W0h, preferred_element_type=jnp.float32) + xw0[:, t, :]
        z = jnp.maximum(z, 0.0)
        # layer 1: Linear(hidden -> hidden) + ReLU
        z = jnp.dot(z, W1, preferred_element_type=jnp.float32) + B1
        z = jnp.maximum(z, 0.0)
        # layer 2 + Euler step (0.1 pre-folded): h <- h + 0.1 * f([h, x])
        h = h + jnp.dot(z, W2s, preferred_element_type=jnp.float32) + B2s
        h_list.append(h)

    # Deferred readout: ONE (T*B, L) @ (L, O) matmul, then assemble the
    # batch-major lane-dense (B, T*O) output slab (single dense store).
    hs = jnp.concatenate(h_list, axis=0)                     # (T*B, L), time-major rows
    y = (jnp.dot(hs, wro_ref[...], preferred_element_type=jnp.float32)
         + bro_ref[...])                                     # (T*B, O)
    out = jnp.concatenate([y[t * B:(t + 1) * B, :] for t in range(T)], axis=1)
    out_ref[...] = out.astype(out_ref.dtype)                 # (B, T*O)


def node_forward(x_btd, params, initial_states=None):
    """x_btd: (B, T, input_size). Returns (B, T, output_size) float32."""
    B, T, D_in = x_btd.shape
    w0h, w0x, b0, w1, b1, w2, b2, wro, bro = params
    L = w0h.shape[0]          # latent_size
    H = w0h.shape[1]          # hidden_size
    O = wro.shape[1]          # output_size

    if initial_states is None:
        initial_states = jnp.zeros((B, L), dtype=jnp.float32)
    else:
        initial_states = jnp.asarray(initial_states, jnp.float32)
        assert initial_states.shape == (B, L), \
            f"initial_states must be (batch, latent) = {(B, L)}"

    x = x_btd.astype(jnp.float32)                 # batch-major, no wrapper transpose

    flops = 2 * T * B * ((L + D_in) * H + H * H + H * L + L * O)
    bytes_accessed = 4 * (x.size + initial_states.size + w0h.size + w0x.size
                          + b0.size + w1.size + b1.size + w2.size + b2.size
                          + wro.size + bro.size + B * T * O)

    vmem = pl.BlockSpec(memory_space=pltpu.MemorySpace.VMEM)   # whole array resident

    out_flat = pl.pallas_call(
        node_kernel,
        out_shape=jax.ShapeDtypeStruct((B, T * O), jnp.float32),
        in_specs=[vmem] * 11,
        out_specs=vmem,
        cost_estimate=pl.CostEstimate(flops=flops, transcendentals=0,
                                      bytes_accessed=bytes_accessed),
    )(x, initial_states, w0h, w0x, b0, w1, b1, w2, b2, wro, bro)

    # out_flat[b, t*O + o] == output[b, t, o]; splitting the minor dim is free.
    return out_flat.reshape(B, T, O)


def init_params(key, input_size, num_layers, hidden_size, latent_size, output_size):
    """Parameter init mirroring the PyTorch module's shapes.

    Weights are stored (in_features, out_features). Linear layers use a
    uniform(-1/sqrt(fan_in), 1/sqrt(fan_in)) init (PyTorch default flavor);
    the readout uses normal(0, 0.01) weight and zero bias as in nODE.init_model.
    """
    assert num_layers == 3  # TODO(synk): generalize kernel to arbitrary num_layers
    ks = jax.random.split(key, 8)

    def linear(kw, kb, fan_in, fan_out):
        bound = 1.0 / jnp.sqrt(fan_in)
        w = jax.random.uniform(kw, (fan_in, fan_out), jnp.float32, -bound, bound)
        b = jax.random.uniform(kb, (1, fan_out), jnp.float32, -bound, bound)
        return w, b

    # layer 0: Linear(input+latent -> hidden); concat order is [hidden, input]
    w0_full, b0 = linear(ks[0], ks[1], input_size + latent_size, hidden_size)
    w0h = w0_full[:latent_size, :]
    w0x = w0_full[latent_size:, :]
    # layer 1: Linear(hidden -> hidden)
    w1, b1 = linear(ks[2], ks[3], hidden_size, hidden_size)
    # layer 2: Linear(hidden -> latent)
    w2, b2 = linear(ks[4], ks[5], hidden_size, latent_size)
    # readout: Linear(latent -> output), normal(0, 0.01) weight, zero bias
    wro = 0.01 * jax.random.normal(ks[6], (latent_size, output_size), jnp.float32)
    bro = jnp.zeros((1, output_size), jnp.float32)
    return (w0h, w0x, b0, w1, b1, w2, b2, wro, bro)


def node_forward_ref(x_btd, params):
    """Pure-JAX reference of the same forward pass (for sanity checking)."""
    w0h, w0x, b0, w1, b1, w2, b2, wro, bro = params
    B, T, _ = x_btd.shape
    L = w0h.shape[0]
    h = jnp.zeros((B, L), jnp.float32)
    outs = []
    for i in range(T):
        x = x_btd[:, i, :]
        z = jnp.maximum(h @ w0h + x @ w0x + b0, 0.0)
        z = jnp.maximum(z @ w1 + b1, 0.0)
        v = z @ w2 + b2
        h = h + 0.1 * v
        outs.append(h @ wro + bro)
    return jnp.stack(outs, axis=1)


if __name__ == "__main__":
    # config: num_layers=3, hidden_size=32, latent_size=32, input_size=16,
    #         output_size=16, output_mapping=None (default readout Linear).
    B, T = 8, 8
    input_size, num_layers, hidden_size, latent_size, output_size = 16, 3, 32, 32, 16

    key = jax.random.PRNGKey(0)
    k_x, k_p = jax.random.split(key)
    x = jax.random.normal(k_x, (B, T, input_size), jnp.float32)
    params = init_params(k_p, input_size, num_layers, hidden_size, latent_size, output_size)

    out = node_forward(x, params)
    out = jax.block_until_ready(out)

    ref = node_forward_ref(x, params)
    assert out.shape == (B, T, output_size)
    assert jnp.allclose(out, ref, atol=1e-5, rtol=1e-5), \
        f"max abs err = {jnp.max(jnp.abs(out - ref))}"

    print("KERNEL_OK")
</pallas_src>

<mosaic_0001>
module attributes {stable_mosaic.version = 11 : i64} {
  func.func @node_kernel(%arg0: memref<8x8x16xf32, #tpu.memory_space<vmem>>, %arg1: memref<8x32xf32, #tpu.memory_space<vmem>>, %arg2: memref<32x32xf32, #tpu.memory_space<vmem>>, %arg3: memref<16x32xf32, #tpu.memory_space<vmem>>, %arg4: memref<1x32xf32, #tpu.memory_space<vmem>>, %arg5: memref<32x32xf32, #tpu.memory_space<vmem>>, %arg6: memref<1x32xf32, #tpu.memory_space<vmem>>, %arg7: memref<32x32xf32, #tpu.memory_space<vmem>>, %arg8: memref<1x32xf32, #tpu.memory_space<vmem>>, %arg9: memref<32x16xf32, #tpu.memory_space<vmem>>, %arg10: memref<1x16xf32, #tpu.memory_space<vmem>>, %arg11: memref<8x128xf32, #tpu.memory_space<vmem>>) attributes {dimension_semantics = [], scalar_prefetch = 0 : i64, scratch_operands = 0 : i64, tpu.core_type = #tpu.core_type<tc>} {
    %c0 = arith.constant 0 : index
    %c0_0 = arith.constant 0 : index
    %0 = vector.load %arg2[%c0, %c0_0] : memref<32x32xf32, #tpu.memory_space<vmem>>, vector<32x32xf32>
    %c0_1 = arith.constant 0 : index
    %c0_2 = arith.constant 0 : index
    %1 = vector.load %arg5[%c0_1, %c0_2] : memref<32x32xf32, #tpu.memory_space<vmem>>, vector<32x32xf32>
    %c0_3 = arith.constant 0 : index
    %c0_4 = arith.constant 0 : index
    %2 = vector.load %arg6[%c0_3, %c0_4] : memref<1x32xf32, #tpu.memory_space<vmem>>, vector<1x32xf32>
    %3 = vector.shape_cast %2 : vector<1x32xf32> to vector<1x32xf32>
    %4 = vector.broadcast %3 : vector<1x32xf32> to vector<8x32xf32>
    %c0_5 = arith.constant 0 : index
    %c0_6 = arith.constant 0 : index
    %5 = vector.load %arg7[%c0_5, %c0_6] : memref<32x32xf32, #tpu.memory_space<vmem>>, vector<32x32xf32>
    %cst = arith.constant 1.000000e-01 : f32
    %6 = vector.broadcast %cst : f32 to vector<32x32xf32>
    %7 = arith.mulf %6, %5 : vector<32x32xf32>
    %c0_7 = arith.constant 0 : index
    %c0_8 = arith.constant 0 : index
    %8 = vector.load %arg8[%c0_7, %c0_8] : memref<1x32xf32, #tpu.memory_space<vmem>>, vector<1x32xf32>
    %cst_9 = arith.constant 1.000000e-01 : f32
    %9 = vector.broadcast %cst_9 : f32 to vector<1x32xf32>
    %10 = arith.mulf %9, %8 : vector<1x32xf32>
    %11 = vector.shape_cast %10 : vector<1x32xf32> to vector<1x32xf32>
    %12 = vector.broadcast %11 : vector<1x32xf32> to vector<8x32xf32>
    %c0_10 = arith.constant 0 : index
    %c0_11 = arith.constant 0 : index
    %c0_12 = arith.constant 0 : index
    %13 = vector.load %arg0[%c0_10, %c0_11, %c0_12] : memref<8x8x16xf32, #tpu.memory_space<vmem>>, vector<8x8x16xf32>
    %14 = vector.shape_cast %13 : vector<8x8x16xf32> to vector<64x16xf32>
    %c0_13 = arith.constant 0 : index
    %c0_14 = arith.constant 0 : index
    %15 = vector.load %arg3[%c0_13, %c0_14] : memref<16x32xf32, #tpu.memory_space<vmem>>, vector<16x32xf32>
    %cst_15 = arith.constant dense<0.000000e+00> : vector<64x32xf32>
    %16 = tpu.matmul %14, %15, %cst_15 {dimension_numbers = #tpu.dot_dimension_numbers<[1], [0], [0], [1], [0, 0, 1, 1], [], []>} : vector<64x16xf32>, vector<16x32xf32>, vector<64x32xf32> -> vector<64x32xf32>
    %c0_16 = arith.constant 0 : index
    %c0_17 = arith.constant 0 : index
    %17 = vector.load %arg4[%c0_16, %c0_17] : memref<1x32xf32, #tpu.memory_space<vmem>>, vector<1x32xf32>
    %18 = vector.broadcast %17 : vector<1x32xf32> to vector<64x32xf32>
    %19 = arith.addf %16, %18 : vector<64x32xf32>
    %20 = vector.shape_cast %19 : vector<64x32xf32> to vector<8x8x32xf32>
    %c0_18 = arith.constant 0 : index
    %c0_19 = arith.constant 0 : index
    %21 = vector.load %arg1[%c0_18, %c0_19] : memref<8x32xf32, #tpu.memory_space<vmem>>, vector<8x32xf32>
    %cst_20 = arith.constant dense<0.000000e+00> : vector<8x32xf32>
    %22 = tpu.matmul %21, %0, %cst_20 {dimension_numbers = #tpu.dot_dimension_numbers<[1], [0], [0], [1], [0, 0, 1, 1], [], []>} : vector<8x32xf32>, vector<32x32xf32>, vector<8x32xf32> -> vector<8x32xf32>
    %23 = vector.extract_strided_slice %20 {offsets = [0, 0, 0], sizes = [8, 1, 32], strides = [1, 1, 1]} : vector<8x8x32xf32> to vector<8x1x32xf32>
    %24 = vector.shape_cast %23 : vector<8x1x32xf32> to vector<8x32xf32>
    %25 = arith.addf %22, %24 : vector<8x32xf32>
    %cst_21 = arith.constant 0.000000e+00 : f32
    %26 = vector.broadcast %cst_21 : f32 to vector<8x32xf32>
    %27 = arith.maximumf %25, %26 : vector<8x32xf32>
    %cst_22 = arith.constant dense<0.000000e+00> : vector<8x32xf32>
    %28 = tpu.matmul %27, %1, %cst_22 {dimension_numbers = #tpu.dot_dimension_numbers<[1], [0], [0], [1], [0, 0, 1, 1], [], []>} : vector<8x32xf32>, vector<32x32xf32>, vector<8x32xf32> -> vector<8x32xf32>
    %29 = arith.addf %28, %4 : vector<8x32xf32>
    %cst_23 = arith.constant 0.000000e+00 : f32
    %30 = vector.broadcast %cst_23 : f32 to vector<8x32xf32>
    %31 = arith.maximumf %29, %30 : vector<8x32xf32>
    %cst_24 = arith.constant dense<0.000000e+00> : vector<8x32xf32>
    %32 = tpu.matmul %31, %7, %cst_24 {dimension_numbers = #tpu.dot_dimension_numbers<[1], [0], [0], [1], [0, 0, 1, 1], [], []>} : vector<8x32xf32>, vector<32x32xf32>, vector<8x32xf32> -> vector<8x32xf32>
    %33 = arith.addf %21, %32 : vector<8x32xf32>
    %34 = arith.addf %33, %12 : vector<8x32xf32>
    %cst_25 = arith.constant dense<0.000000e+00> : vector<8x32xf32>
    %35 = tpu.matmul %34, %0, %cst_25 {dimension_numbers = #tpu.dot_dimension_numbers<[1], [0], [0], [1], [0, 0, 1, 1], [], []>} : vector<8x32xf32>, vector<32x32xf32>, vector<8x32xf32> -> vector<8x32xf32>
    %36 = vector.extract_strided_slice %20 {offsets = [0, 1, 0], sizes = [8, 1, 32], strides = [1, 1, 1]} : vector<8x8x32xf32> to vector<8x1x32xf32>
    %37 = vector.shape_cast %36 : vector<8x1x32xf32> to vector<8x32xf32>
    %38 = arith.addf %35, %37 : vector<8x32xf32>
    %cst_26 = arith.constant 0.000000e+00 : f32
    %39 = vector.broadcast %cst_26 : f32 to vector<8x32xf32>
    %40 = arith.maximumf %38, %39 : vector<8x32xf32>
    %cst_27 = arith.constant dense<0.000000e+00> : vector<8x32xf32>
    %41 = tpu.matmul %40, %1, %cst_27 {dimension_numbers = #tpu.dot_dimension_numbers<[1], [0], [0], [1], [0, 0, 1, 1], [], []>} : vector<8x32xf32>, vector<32x32xf32>, vector<8x32xf32> -> vector<8x32xf32>
    %42 = arith.addf %41, %4 : vector<8x32xf32>
    %cst_28 = arith.constant 0.000000e+00 : f32
    %43 = vector.broadcast %cst_28 : f32 to vector<8x32xf32>
    %44 = arith.maximumf %42, %43 : vector<8x32xf32>
    %cst_29 = arith.constant dense<0.000000e+00> : vector<8x32xf32>
    %45 = tpu.matmul %44, %7, %cst_29 {dimension_numbers = #tpu.dot_dimension_numbers<[1], [0], [0], [1], [0, 0, 1, 1], [], []>} : vector<8x32xf32>, vector<32x32xf32>, vector<8x32xf32> -> vector<8x32xf32>
    %46 = arith.addf %34, %45 : vector<8x32xf32>
    %47 = arith.addf %46, %12 : vector<8x32xf32>
    %cst_30 = arith.constant dense<0.000000e+00> : vector<8x32xf32>
    %48 = tpu.matmul %47, %0, %cst_30 {dimension_numbers = #tpu.dot_dimension_numbers<[1], [0], [0], [1], [0, 0, 1, 1], [], []>} : vector<8x32xf32>, vector<32x32xf32>, vector<8x32xf32> -> vector<8x32xf32>
    %49 = vector.extract_strided_slice %20 {offsets = [0, 2, 0], sizes = [8, 1, 32], strides = [1, 1, 1]} : vector<8x8x32xf32> to vector<8x1x32xf32>
    %50 = vector.shape_cast %49 : vector<8x1x32xf32> to vector<8x32xf32>
    %51 = arith.addf %48, %50 : vector<8x32xf32>
    %cst_31 = arith.constant 0.000000e+00 : f32
    %52 = vector.broadcast %cst_31 : f32 to vector<8x32xf32>
    %53 = arith.maximumf %51, %52 : vector<8x32xf32>
    %cst_32 = arith.constant dense<0.000000e+00> : vector<8x32xf32>
    %54 = tpu.matmul %53, %1, %cst_32 {dimension_numbers = #tpu.dot_dimension_numbers<[1], [0], [0], [1], [0, 0, 1, 1], [], []>} : vector<8x32xf32>, vector<32x32xf32>, vector<8x32xf32> -> vector<8x32xf32>
    %55 = arith.addf %54, %4 : vector<8x32xf32>
    %cst_33 = arith.constant 0.000000e+00 : f32
    %56 = vector.broadcast %cst_33 : f32 to vector<8x32xf32>
    %57 = arith.maximumf %55, %56 : vector<8x32xf32>
    %cst_34 = arith.constant dense<0.000000e+00> : vector<8x32xf32>
    %58 = tpu.matmul %57, %7, %cst_34 {dimension_numbers = #tpu.dot_dimension_numbers<[1], [0], [0], [1], [0, 0, 1, 1], [], []>} : vector<8x32xf32>, vector<32x32xf32>, vector<8x32xf32> -> vector<8x32xf32>
    %59 = arith.addf %47, %58 : vector<8x32xf32>
    %60 = arith.addf %59, %12 : vector<8x32xf32>
    %cst_35 = arith.constant dense<0.000000e+00> : vector<8x32xf32>
    %61 = tpu.matmul %60, %0, %cst_35 {dimension_numbers = #tpu.dot_dimension_numbers<[1], [0], [0], [1], [0, 0, 1, 1], [], []>} : vector<8x32xf32>, vector<32x32xf32>, vector<8x32xf32> -> vector<8x32xf32>
    %62 = vector.extract_strided_slice %20 {offsets = [0, 3, 0], sizes = [8, 1, 32], strides = [1, 1, 1]} : vector<8x8x32xf32> to vector<8x1x32xf32>
    %63 = vector.shape_cast %62 : vector<8x1x32xf32> to vector<8x32xf32>
    %64 = arith.addf %61, %63 : vector<8x32xf32>
    %cst_36 = arith.constant 0.000000e+00 : f32
    %65 = vector.broadcast %cst_36 : f32 to vector<8x32xf32>
    %66 = arith.maximumf %64, %65 : vector<8x32xf32>
    %cst_37 = arith.constant dense<0.000000e+00> : vector<8x32xf32>
    %67 = tpu.matmul %66, %1, %cst_37 {dimension_numbers = #tpu.dot_dimension_numbers<[1], [0], [0], [1], [0, 0, 1, 1], [], []>} : vector<8x32xf32>, vector<32x32xf32>, vector<8x32xf32> -> vector<8x32xf32>
    %68 = arith.addf %67, %4 : vector<8x32xf32>
    %cst_38 = arith.constant 0.000000e+00 : f32
    %69 = vector.broadcast %cst_38 : f32 to vector<8x32xf32>
    %70 = arith.maximumf %68, %69 : vector<8x32xf32>
    %cst_39 = arith.constant dense<0.000000e+00> : vector<8x32xf32>
    %71 = tpu.matmul %70, %7, %cst_39 {dimension_numbers = #tpu.dot_dimension_numbers<[1], [0], [0], [1], [0, 0, 1, 1], [], []>} : vector<8x32xf32>, vector<32x32xf32>, vector<8x32xf32> -> vector<8x32xf32>
    %72 = arith.addf %60, %71 : vector<8x32xf32>
    %73 = arith.addf %72, %12 : vector<8x32xf32>
    %cst_40 = arith.constant dense<0.000000e+00> : vector<8x32xf32>
    %74 = tpu.matmul %73, %0, %cst_40 {dimension_numbers = #tpu.dot_dimension_numbers<[1], [0], [0], [1], [0, 0, 1, 1], [], []>} : vector<8x32xf32>, vector<32x32xf32>, vector<8x32xf32> -> vector<8x32xf32>
    %75 = vector.extract_strided_slice %20 {offsets = [0, 4, 0], sizes = [8, 1, 32], strides = [1, 1, 1]} : vector<8x8x32xf32> to vector<8x1x32xf32>
    %76 = vector.shape_cast %75 : vector<8x1x32xf32> to vector<8x32xf32>
    %77 = arith.addf %74, %76 : vector<8x32xf32>
    %cst_41 = arith.constant 0.000000e+00 : f32
    %78 = vector.broadcast %cst_41 : f32 to vector<8x32xf32>
    %79 = arith.maximumf %77, %78 : vector<8x32xf32>
    %cst_42 = arith.constant dense<0.000000e+00> : vector<8x32xf32>
    %80 = tpu.matmul %79, %1, %cst_42 {dimension_numbers = #tpu.dot_dimension_numbers<[1], [0], [0], [1], [0, 0, 1, 1], [], []>} : vector<8x32xf32>, vector<32x32xf32>, vector<8x32xf32> -> vector<8x32xf32>
    %81 = arith.addf %80, %4 : vector<8x32xf32>
    %cst_43 = arith.constant 0.000000e+00 : f32
    %82 = vector.broadcast %cst_43 : f32 to vector<8x32xf32>
    %83 = arith.maximumf %81, %82 : vector<8x32xf32>
    %cst_44 = arith.constant dense<0.000000e+00> : vector<8x32xf32>
    %84 = tpu.matmul %83, %7, %cst_44 {dimension_numbers = #tpu.dot_dimension_numbers<[1], [0], [0], [1], [0, 0, 1, 1], [], []>} : vector<8x32xf32>, vector<32x32xf32>, vector<8x32xf32> -> vector<8x32xf32>
    %85 = arith.addf %73, %84 : vector<8x32xf32>
    %86 = arith.addf %85, %12 : vector<8x32xf32>
    %cst_45 = arith.constant dense<0.000000e+00> : vector<8x32xf32>
    %87 = tpu.matmul %86, %0, %cst_45 {dimension_numbers = #tpu.dot_dimension_numbers<[1], [0], [0], [1], [0, 0, 1, 1], [], []>} : vector<8x32xf32>, vector<32x32xf32>, vector<8x32xf32> -> vector<8x32xf32>
    %88 = vector.extract_strided_slice %20 {offsets = [0, 5, 0], sizes = [8, 1, 32], strides = [1, 1, 1]} : vector<8x8x32xf32> to vector<8x1x32xf32>
    %89 = vector.shape_cast %88 : vector<8x1x32xf32> to vector<8x32xf32>
    %90 = arith.addf %87, %89 : vector<8x32xf32>
    %cst_46 = arith.constant 0.000000e+00 : f32
    %91 = vector.broadcast %cst_46 : f32 to vector<8x32xf32>
    %92 = arith.maximumf %90, %91 : vector<8x32xf32>
    %cst_47 = arith.constant dense<0.000000e+00> : vector<8x32xf32>
    %93 = tpu.matmul %92, %1, %cst_47 {dimension_numbers = #tpu.dot_dimension_numbers<[1], [0], [0], [1], [0, 0, 1, 1], [], []>} : vector<8x32xf32>, vector<32x32xf32>, vector<8x32xf32> -> vector<8x32xf32>
    %94 = arith.addf %93, %4 : vector<8x32xf32>
    %cst_48 = arith.constant 0.000000e+00 : f32
    %95 = vector.broadcast %cst_48 : f32 to vector<8x32xf32>
    %96 = arith.maximumf %94, %95 : vector<8x32xf32>
    %cst_49 = arith.constant dense<0.000000e+00> : vector<8x32xf32>
    %97 = tpu.matmul %96, %7, %cst_49 {dimension_numbers = #tpu.dot_dimension_numbers<[1], [0], [0], [1], [0, 0, 1, 1], [], []>} : vector<8x32xf32>, vector<32x32xf32>, vector<8x32xf32> -> vector<8x32xf32>
    %98 = arith.addf %86, %97 : vector<8x32xf32>
    %99 = arith.addf %98, %12 : vector<8x32xf32>
    %cst_50 = arith.constant dense<0.000000e+00> : vector<8x32xf32>
    %100 = tpu.matmul %99, %0, %cst_50 {dimension_numbers = #tpu.dot_dimension_numbers<[1], [0], [0], [1], [0, 0, 1, 1], [], []>} : vector<8x32xf32>, vector<32x32xf32>, vector<8x32xf32> -> vector<8x32xf32>
    %101 = vector.extract_strided_slice %20 {offsets = [0, 6, 0], sizes = [8, 1, 32], strides = [1, 1, 1]} : vector<8x8x32xf32> to vector<8x1x32xf32>
    %102 = vector.shape_cast %101 : vector<8x1x32xf32> to vector<8x32xf32>
    %103 = arith.addf %100, %102 : vector<8x32xf32>
    %cst_51 = arith.constant 0.000000e+00 : f32
    %104 = vector.broadcast %cst_51 : f32 to vector<8x32xf32>
    %105 = arith.maximumf %103, %104 : vector<8x32xf32>
    %cst_52 = arith.constant dense<0.000000e+00> : vector<8x32xf32>
    %106 = tpu.matmul %105, %1, %cst_52 {dimension_numbers = #tpu.dot_dimension_numbers<[1], [0], [0], [1], [0, 0, 1, 1], [], []>} : vector<8x32xf32>, vector<32x32xf32>, vector<8x32xf32> -> vector<8x32xf32>
    %107 = arith.addf %106, %4 : vector<8x32xf32>
    %cst_53 = arith.constant 0.000000e+00 : f32
    %108 = vector.broadcast %cst_53 : f32 to vector<8x32xf32>
    %109 = arith.maximumf %107, %108 : vector<8x32xf32>
    %cst_54 = arith.constant dense<0.000000e+00> : vector<8x32xf32>
    %110 = tpu.matmul %109, %7, %cst_54 {dimension_numbers = #tpu.dot_dimension_numbers<[1], [0], [0], [1], [0, 0, 1, 1], [], []>} : vector<8x32xf32>, vector<32x32xf32>, vector<8x32xf32> -> vector<8x32xf32>
    %111 = arith.addf %99, %110 : vector<8x32xf32>
    %112 = arith.addf %111, %12 : vector<8x32xf32>
    %cst_55 = arith.constant dense<0.000000e+00> : vector<8x32xf32>
    %113 = tpu.matmul %112, %0, %cst_55 {dimension_numbers = #tpu.dot_dimension_numbers<[1], [0], [0], [1], [0, 0, 1, 1], [], []>} : vector<8x32xf32>, vector<32x32xf32>, vector<8x32xf32> -> vector<8x32xf32>
    %114 = vector.extract_strided_slice %20 {offsets = [0, 7, 0], sizes = [8, 1, 32], strides = [1, 1, 1]} : vector<8x8x32xf32> to vector<8x1x32xf32>
    %115 = vector.shape_cast %114 : vector<8x1x32xf32> to vector<8x32xf32>
    %116 = arith.addf %113, %115 : vector<8x32xf32>
    %cst_56 = arith.constant 0.000000e+00 : f32
    %117 = vector.broadcast %cst_56 : f32 to vector<8x32xf32>
    %118 = arith.maximumf %116, %117 : vector<8x32xf32>
    %cst_57 = arith.constant dense<0.000000e+00> : vector<8x32xf32>
    %119 = tpu.matmul %118, %1, %cst_57 {dimension_numbers = #tpu.dot_dimension_numbers<[1], [0], [0], [1], [0, 0, 1, 1], [], []>} : vector<8x32xf32>, vector<32x32xf32>, vector<8x32xf32> -> vector<8x32xf32>
    %120 = arith.addf %119, %4 : vector<8x32xf32>
    %cst_58 = arith.constant 0.000000e+00 : f32
    %121 = vector.broadcast %cst_58 : f32 to vector<8x32xf32>
    %122 = arith.maximumf %120, %121 : vector<8x32xf32>
    %cst_59 = arith.constant dense<0.000000e+00> : vector<8x32xf32>
    %123 = tpu.matmul %122, %7, %cst_59 {dimension_numbers = #tpu.dot_dimension_numbers<[1], [0], [0], [1], [0, 0, 1, 1], [], []>} : vector<8x32xf32>, vector<32x32xf32>, vector<8x32xf32> -> vector<8x32xf32>
    %124 = arith.addf %112, %123 : vector<8x32xf32>
    %125 = arith.addf %124, %12 : vector<8x32xf32>
    %126 = tpu.concatenate %34, %47, %60, %73, %86, %99, %112, %125 in 0 : vector<8x32xf32>, vector<8x32xf32>, vector<8x32xf32>, vector<8x32xf32>, vector<8x32xf32>, vector<8x32xf32>, vector<8x32xf32>, vector<8x32xf32> -> vector<64x32xf32>
    %c0_60 = arith.constant 0 : index
    %c0_61 = arith.constant 0 : index
    %127 = vector.load %arg9[%c0_60, %c0_61] : memref<32x16xf32, #tpu.memory_space<vmem>>, vector<32x16xf32>
    %cst_62 = arith.constant dense<0.000000e+00> : vector<64x16xf32>
    %128 = tpu.matmul %126, %127, %cst_62 {dimension_numbers = #tpu.dot_dimension_numbers<[1], [0], [0], [1], [0, 0, 1, 1], [], []>} : vector<64x32xf32>, vector<32x16xf32>, vector<64x16xf32> -> vector<64x16xf32>
    %c0_63 = arith.constant 0 : index
    %c0_64 = arith.constant 0 : index
    %129 = vector.load %arg10[%c0_63, %c0_64] : memref<1x16xf32, #tpu.memory_space<vmem>>, vector<1x16xf32>
    %130 = vector.broadcast %129 : vector<1x16xf32> to vector<64x16xf32>
    %131 = arith.addf %128, %130 : vector<64x16xf32>
    %132 = vector.extract_strided_slice %131 {offsets = [0, 0], sizes = [8, 16], strides = [1, 1]} : vector<64x16xf32> to vector<8x16xf32>
    %133 = vector.extract_strided_slice %131 {offsets = [8, 0], sizes = [8, 16], strides = [1, 1]} : vector<64x16xf32> to vector<8x16xf32>
    %134 = vector.extract_strided_slice %131 {offsets = [16, 0], sizes = [8, 16], strides = [1, 1]} : vector<64x16xf32> to vector<8x16xf32>
    %135 = vector.extract_strided_slice %131 {offsets = [24, 0], sizes = [8, 16], strides = [1, 1]} : vector<64x16xf32> to vector<8x16xf32>
    %136 = vector.extract_strided_slice %131 {offsets = [32, 0], sizes = [8, 16], strides = [1, 1]} : vector<64x16xf32> to vector<8x16xf32>
    %137 = vector.extract_strided_slice %131 {offsets = [40, 0], sizes = [8, 16], strides = [1, 1]} : vector<64x16xf32> to vector<8x16xf32>
    %138 = vector.extract_strided_slice %131 {offsets = [48, 0], sizes = [8, 16], strides = [1, 1]} : vector<64x16xf32> to vector<8x16xf32>
    %139 = vector.extract_strided_slice %131 {offsets = [56, 0], sizes = [8, 16], strides = [1, 1]} : vector<64x16xf32> to vector<8x16xf32>
    %140 = tpu.concatenate %132, %133, %134, %135, %136, %137, %138, %139 in 1 : vector<8x16xf32>, vector<8x16xf32>, vector<8x16xf32>, vector<8x16xf32>, vector<8x16xf32>, vector<8x16xf32>, vector<8x16xf32>, vector<8x16xf32> -> vector<8x128xf32>
    %c0_65 = arith.constant 0 : index
    %c0_66 = arith.constant 0 : index
    %141 = vector.load %arg11[%c0_65, %c0_66] : memref<8x128xf32, #tpu.memory_space<vmem>>, vector<8x128xf32>
    tpu.vector_store %arg11[%c0_65, %c0_66], %140 {strides = array<i32>} : memref<8x128xf32, #tpu.memory_space<vmem>>, vector<8x128xf32>,
    return
  }
}

</mosaic_0001>

<bundles_post_ra>
// kernel: tpu_custom_call.1
= control target key start
LH: loop header
LB: loop body
LE: loop exit
PB: predicated region body
PF: predicated region fallthrough
CT: control target
= control target key end

     0   :  { %16 = vsyncpa [#allocation3], 0  ;;  %s3788_s0 = inlined_call_operand.hbm [shape: f32[8,8,16], index: 0, kind: input, shape index: {}]   ;;  %s3789_s1 = inlined_call_operand.hbm [shape: f32[8,32], index: 1, kind: input, shape index: {}]   ;;  %s3790_s2 = inlined_call_operand.vmem [shape: f32[32,32], index: 2, kind: input, shape index: {}]   ;;  %s3791_s3 = inlined_call_operand.hbm [shape: f32[16,32], index: 3, kind: input, shape index: {}]   ;;  %s3792_s4 = inlined_call_operand.vmem [shape: f32[1,32], index: 4, kind: input, shape index: {}]   ;;  %s3793_s5 = inlined_call_operand.vmem [shape: f32[32,32], index: 5, kind: input, shape index: {}]   ;;  %s3794_s6 = inlined_call_operand.vmem [shape: f32[1,32], index: 6, kind: input, shape index: {}]   ;;  %s3795_s7 = inlined_call_operand.hbm [shape: f32[32,32], index: 7, kind: input, shape index: {}]   ;;  %s3796_s8 = inlined_call_operand.hbm [shape: f32[1,32], index: 8, kind: input, shape index: {}]   ;;  %s3797_s9 = inlined_call_operand.vmem [shape: f32[32,16], index: 9, kind: input, shape index: {}]   ;;  %s3798_s10 = inlined_call_operand.vmem [shape: f32[1,16], index: 10, kind: input, shape index: {}]   ;;  %s3799_s11 = inlined_call_operand.hbm [shape: f32[8,128], index: 11, kind: output, shape index: {}]  }
   0x1   :  { %17 = vsyncpa [#allocation6], 0 }
   0x2   :  { %18 = vsyncpa [#allocation9], 0 }
   0x3   :  { %19 = vsyncpa [#allocation4], 0  ;;  %s3180_s17 = smov [#allocation5]   ;;  %s3040_s21 = scalar_lea.hbm %s3789_s1, 128 }
   0x4   :  { %s38_s18 = sshll.u32 %s3180_s17, 4  ;;  %p3041_p0 = scmp.ne.s32.totalorder %s3789_s1, %s3040_s21  ;;  %s39_s18 = int_to_ptr.vmem [resolvable:$true] %s38_s18 }
   0x5   :  { %p3044_p1 = scmp.lt.u32.totalorder %s3040_s21, %s3789_s1 }
   0x7   :  { %p3046_p2 = pnand %p3044_p1, %p3041_p0 }
   0x9   :  { %3049 = shalt.err (!%p3046_p2)
}
   0xa   :  { %s3050_s26 = scalar_lea.vmem %s39_s18, 128  ;;  %p3055_p4 = scmp.lt.s32.totalorder %s39_s18, %s39_s18 }
   0xb   :  { %p3051_p3 = scmp.ne.s32.totalorder %s39_s18, %s3050_s26  ;;  %p3056_p5 = scmp.lt.s32.totalorder %s3050_s26, %s3050_s26 }
   0xd   :  { %p3057_p6 = por %p3056_p5, %p3055_p4 }
   0xf   :  { %p3058_p7 = pnand %p3057_p6, %p3051_p3 }
  0x11   :  { %3061 = shalt.err (!%p3058_p7)
}
  0x12   :  { %41 = dma.hbm_to_vmem [thread:$0]  %s3789_s1, 128, %s39_s18, [#allocation6]  }
  0x13   :  { %s3181_s29 = smov [#allocation8]   ;;  %s3182_s12 = smov [#allocation2]  }
  0x14   :  { %s67_s30 = sshll.u32 %s3181_s29, 4  ;;  %s25_s13 = sshll.u32 %s3182_s12, 4  ;;  %s68_s30 = int_to_ptr.vmem [resolvable:$true] %s67_s30  ;;  %s26_s13 = int_to_ptr.vmem [resolvable:$true] %s25_s13 }
  0x15   :  { %s3062_s16 = scalar_lea.hbm %s3795_s7, 512 }
  0x16   :  { %p3063_p8 = scmp.ne.s32.totalorder %s3795_s7, %s3062_s16  ;;  %p3066_p9 = scmp.lt.u32.totalorder %s3062_s16, %s3795_s7 }
  0x18   :  { %p3068_p10 = pnand %p3066_p9, %p3063_p8 }
  0x1a   :  { %3071 = shalt.err (!%p3068_p10)
}
  0x1b   :  { %s3072_s1 = scalar_lea.vmem %s68_s30, 512  ;;  %p3077_p12 = scmp.lt.s32.totalorder %s68_s30, %s68_s30 }
  0x1c   :  { %p3073_p11 = scmp.ne.s32.totalorder %s68_s30, %s3072_s1  ;;  %p3078_p13 = scmp.lt.s32.totalorder %s3072_s1, %s3072_s1 }
  0x1e   :  { %p3079_p0 = por %p3078_p13, %p3077_p12 }
  0x20   :  { %p3080_p1 = pnand %p3079_p0, %p3073_p11 }
  0x22   :  { %3083 = shalt.err (!%p3080_p1)
}
  0x23   :  { %s3183_s18 = smov 128   ;;  %s3184_s22 = smov 8  }
  0x24   :  { %73 = dma.hbm_to_vmem [thread:$0]  %s3795_s7, 512, %s68_s30, [#allocation9], %s3183_s18, %s3183_s18, %s3184_s22  }
  0x25   :  { %s3084_s27 = scalar_lea.hbm %s3788_s0, 1024 }
  0x26   :  { %p3085_p2 = scmp.ne.s32.totalorder %s3788_s0, %s3084_s27  ;;  %p3088_p3 = scmp.lt.u32.totalorder %s3084_s27, %s3788_s0 }
  0x28   :  { %p3090_p4 = pnand %p3088_p3, %p3085_p2 }
  0x2a   :  { %3093 = shalt.err (!%p3090_p4)
}
  0x2b   :  { %s3094_s15 = scalar_lea.vmem %s26_s13, 1024  ;;  %p3099_p6 = scmp.lt.s32.totalorder %s26_s13, %s26_s13 }
  0x2c   :  { %p3095_p5 = scmp.ne.s32.totalorder %s26_s13, %s3094_s15  ;;  %p3100_p7 = scmp.lt.s32.totalorder %s3094_s15, %s3094_s15 }
  0x2e   :  { %p3101_p8 = por %p3100_p7, %p3099_p6 }
  0x30   :  { %p3102_p9 = pnand %p3101_p8, %p3095_p5 }
  0x32   :  { %3105 = shalt.err (!%p3102_p9)
}
  0x33   :  { %31 = dma.hbm_to_vmem [thread:$0]  %s3788_s0, 1024, %s26_s13, [#allocation3], %s3183_s18, %s3183_s18, %s3184_s22  }
  0x34   :  { %s3185_s16 = smov [#allocation7]   ;;  %s3186_s19 = smov [#allocation10]  }
  0x35   :  { %s49_s17 = sshll.u32 %s3185_s16, 4  ;;  %s80_s20 = sshll.u32 %s3186_s19, 4  ;;  %s50_s17 = int_to_ptr.vmem [resolvable:$true] %s49_s17  ;;  %s81_s20 = int_to_ptr.vmem [resolvable:$true] %s80_s20 }
  0x36   :  { %s3106_s23 = scalar_lea.hbm %s3791_s3, 256 }
  0x37   :  { %p3107_p10 = scmp.ne.s32.totalorder %s3791_s3, %s3106_s23  ;;  %p3110_p11 = scmp.lt.u32.totalorder %s3106_s23, %s3791_s3 }
  0x39   :  { %p3112_p12 = pnand %p3110_p11, %p3107_p10 }
  0x3b   :  { %3115 = shalt.err (!%p3112_p12)
}
  0x3c   :  { %s3116_s0 = scalar_lea.vmem %s50_s17, 256  ;;  %p3121_p0 = scmp.lt.s32.totalorder %s50_s17, %s50_s17 }
  0x3d   :  { %p3117_p13 = scmp.ne.s32.totalorder %s50_s17, %s3116_s0  ;;  %p3122_p1 = scmp.lt.s32.totalorder %s3116_s0, %s3116_s0 }
  0x3f   :  { %p3123_p2 = por %p3122_p1, %p3121_p0 }
  0x41   :  { %p3124_p3 = pnand %p3123_p2, %p3117_p13 }
  0x43   :  { %3127 = shalt.err (!%p3124_p3)
}
  0x44   :  { %55 = dma.hbm_to_vmem [thread:$0]  %s3791_s3, 256, %s50_s17, [#allocation6], %s3183_s18, %s3183_s18, %s3184_s22  }
  0x45   :  { %s3128_s14 = scalar_lea.hbm %s3796_s8, 16 }
  0x46   :  { %p3129_p4 = scmp.ne.s32.totalorder %s3796_s8, %s3128_s14  ;;  %p3132_p5 = scmp.lt.u32.totalorder %s3128_s14, %s3796_s8 }
  0x48   :  { %p3134_p6 = pnand %p3132_p5, %p3129_p4 }
  0x4a   :  { %3137 = shalt.err (!%p3134_p6)
}
  0x4b   :  { %s3138_s19 = scalar_lea.vmem %s81_s20, 16  ;;  %s3142_s21 = scalar_lea.vmem %s81_s20, 32 }
  0x4c   :  { %p3139_p7 = scmp.ne.s32.totalorder %s81_s20, %s3138_s19  ;;  %p3143_p8 = scmp.lt.s32.totalorder %s81_s20, %s81_s20 }
  0x4d   :  { %p3144_p9 = scmp.lt.s32.totalorder %s3142_s21, %s3138_s19 }
  0x4f   :  { %p3145_p10 = por %p3144_p9, %p3143_p8 }
  0x51   :  { %p3146_p11 = pnand %p3145_p10, %p3139_p7 }
  0x53   :  { %3149 = shalt.err (!%p3146_p11)
}
  0x54   :  { %83 = dma.hbm_to_vmem [thread:$0]  %s3796_s8, 16, %s81_s20, [#allocation9]  }
  0x55   :  { %3172 = dma.done.wait [#allocation3], 1024  }
  0x56   :  { %3173 = vsyncadd [#allocation3], 4294966272 }
  0x57   :  { %3174 = dma.done.wait [#allocation6], 384  }
  0x58   :  { %3175 = vsyncadd [#allocation6], 4294966912 }
  0x59   :  { %3176 = dma.done.wait [#allocation9], 528  }
  0x5a   :  { %3177 = vsyncadd [#allocation9], 4294966768  ;;  %vm151_vm0 = vcmask 130048   ;;  %v142_v0 = vld [vmem:[#allocation7] sm:$0xff]  ;;  %v143_v1 = vld [vmem:[#allocation7 + $0x8] sm:$0xff]  ;;  %v3187_v11 = vmov 0.0|0.0  }
  0x5b   :  { %v134_v2 = vld [vmem:[#allocation2] sm:$0xff]  ;;  %v2864_v3 = vpack.c.bf16 %v143_v1, %v142_v0  ;;  %v104_v6 = vld [vmem:[%s3790_s2 + $0x8] sm:$0xff]  ;;  %v136_v9 = vld [vmem:[#allocation2 + $0x10] sm:$0xff]  ;;  %vm3188_vm1 = vmmov 0   ;;  %v3189_v18 = vmov 0.0   ;;  %vm312_vm2 = vcmask 261120  }
  0x5c   :  { %2568 = vmatprep.mubr.msk.f32.mxu0 %vm151_vm0, %v134_v2  ;;  %v138_v4 = vld [vmem:[#allocation2 + $0x20] sm:$0xff]  ;;  %v135_v7 = vld [vmem:[#allocation2 + $0x8] sm:$0xff]  ;;  %v140_v10 = vld [vmem:[#allocation2 + $0x30] sm:$0xff]  ;;  %vm291_vm3 = vcmask 1041409   ;;  %vm294_vm4 = vcmask 1042434   ;;  %vm297_vm5 = vcmask 1043459  }
  0x5d   :  { %2574 = vmatprep.mubr.msk.f32.mxu1 %vm151_vm0, %v138_v4  ;;  %2865 = vmatprep.subr.bf16.mxu0 %v2864_v3  ;;  %v103_v5 = vld [vmem:[%s3790_s2] sm:$0xff]  ;;  %v139_v8 = vld [vmem:[#allocation2 + $0x28] sm:$0xff]  ;;  %v105_v13 = vld [vmem:[%s3790_s2 + $0x10] sm:$0xff]  ;;  %vm300_vm6 = vcmask 1044484   ;;  %vm303_vm7 = vcmask 1045509   ;;  %vm306_vm8 = vcmask 1046534  }
  0x5e   :  { %3020 = vmatprep.subr.bf16.mxu1 %v2864_v3  ;;  %2867 = vmatpush3.bf16.msra.mxu0 %v2864_v3  ;;  %v3336_v12 = vpack.c.bf16 %v104_v6, %v103_v5  ;;  %v106_v14 = vld [vmem:[%s3790_s2 + $0x18] sm:$0xff]  ;;  %v3360_v19 = vld [vmem:[#allocation5] sm:$0xff]  ;;  %v108_v21 = vld [vmem:[%s3793_s5 + $0x8] sm:$0xff]  ;;  %vm309_vm9 = vcmask 1047559   ;;  %s3190_s8 = smov 16   ;;  %s3191_s17 = smov 48  }
  0x5f   :  { %3021 = vmatpush3.bf16.msra.mxu1 %v2864_v3  ;;  %2880 = vmatprep.subr.bf16.mxu0 %v3187_v11  ;;  %v137_v15 = vld [vmem:[#allocation2 + $0x18] sm:$0xff]  ;;  %v3350_v17 = vpack.c.bf16 %v106_v14, %v105_v13  ;;  %v107_v20 = vld [vmem:[%s3793_s5] sm:$0xff]  ;;  %v109_v23 = vld [vmem:[%s3793_s5 + $0x10] sm:$0xff]  ;;  %s3192_s20 = smov 32   ;;  %s3193_s1 = smov 64   ;;  %vm2351_vm10 = vcmask 392192  }
  0x60   :  { %2868 = vmatprep.subr.bf16.mxu1 %v3187_v11  ;;  %v141_v16 = vld [vmem:[#allocation2 + $0x38] sm:$0xff]  ;;  %v3373_v22 = vpack.c.bf16 %v108_v21, %v107_v20  ;;  %v119_v27 = vld [vmem:[#allocation8 + $0x8] sm:$0xff]  ;;  %s3195_s23 = smov 112   ;;  %s3196_s24 = smov 96   ;;  %vm2353_vm11 = vcmask 523264   ;;  %vm2355_vm12 = vcmask 654336  }
  0x61   :  { %2569 = vmatmul.mubr.msk.f32.vlgmr.msra.gmra.mrb[0].mxu0 %vm151_vm0, %v135_v7  ;;  %v110_v24 = vld [vmem:[%s3793_s5 + $0x18] sm:$0xff]  ;;  %v123_v29 = vmul.f32 0.1, %v119_v27  ;;  %v2380_v31 = vld [vmem:[%s3792_s4] ss:$0 sm:$0xff]  ;;  %vm2357_vm13 = vcmask 785408  }
  0x62   :  { %2575 = vmatmul.mubr.msk.f32.vlgmr.msra.gmra.mrb[0].mxu1 %vm151_vm0, %v139_v8  ;;  %2571 = vmatprep.mubr.msk.f32.mxu0 %vm151_vm0, %v136_v9  ;;  %v3383_v25 = vpack.c.bf16 %v110_v24, %v109_v23  ;;  %v118_v26 = vld [vmem:[#allocation8] sm:$0xff]  ;;  %s3197_s25 = smov [#allocation11]   ;;  %vm2359_vm14 = vcmask 916480  }
  0x63   :  { %2577 = vmatprep.mubr.msk.f32.mxu1 %vm151_vm0, %v140_v10  ;;  %2870 = vmatpush3.bf16.msra.mxu1 %v3336_v12  ;;  %v122_v28 = vmul.f32 0.1, %v118_v26  ;;  %s2368_s2 = sshll.u32 %s3197_s25, 4  ;;  %s2369_s2 = int_to_ptr.vmem [resolvable:$true] %s2368_s2 }
  0x64   :  { %2871 = vmatprep.subr.bf16.mxu1 %v3187_v11  ;;  %s3150_s26 = scalar_lea.vmem %s2369_s2, 128  ;;  %p3155_p13 = scmp.lt.s32.totalorder %s2369_s2, %s2369_s2 }
  0x65   :  { %2572 = vmatmul.mubr.msk.f32.gmra.mrb[2].mxu0 %vm151_vm0, %v137_v15  ;;  %v3387_v30 = vpack.c.bf16 %v123_v29, %v122_v28  ;;  %p3151_p12 = scmp.ne.s32.totalorder %s2369_s2, %s3150_s26  ;;  %p3156_p0 = scmp.lt.s32.totalorder %s3150_s26, %s3150_s26 }
  0x66   :  { %2578 = vmatmul.mubr.msk.f32.gmra.mrb[2].mxu1 %vm151_vm0, %v141_v16  ;;  %2610 = vmatprep.mubr.msk.f32.mxu0 %vm3188_vm1, %v3189_v18 }
  0x67   :  { %2588 = vmatprep.mubr.msk.f32.mxu1 %vm3188_vm1, %v3189_v18  ;;  %2873 = vmatpush3.bf16.msra.mxu1 %v3350_v17  ;;  %p3157_p1 = por %p3156_p0, %p3155_p13 }
  0x68   :  { %2874 = vmatprep.subr.bf16.mxu1 %v3187_v11  ;;  %2882 = vmatpush3.bf16.msra.mxu0 %v3387_v30 }
  0x69   :  { %2883 = vmatprep.subr.bf16.mxu0 %v3187_v11  ;;  %p3158_p2 = pnand %p3157_p1, %p3151_p12 }
  0x6a   :  { %2589 = vmatmul.mubr.msk.f32.vlgmr.msra.gmra.mrb[4].mxu1 %vm312_vm2, %v3360_v19 }
  0x6b   :  { %2599 = vmatprep.mubr.msk.f32.mxu1 %vm3188_vm1, %v3189_v18  ;;  %2876 = vmatpush3.bf16.msra.mxu1 %v3373_v22 }
  0x6c   :  { %2877 = vmatprep.subr.bf16.mxu1 %v3187_v11 }
  0x6f   :  { %2879 = vmatpush3.bf16.msra.mxu1 %v3383_v25 }
  0x70   :  { %2886 = vmatprep.subr.bf16.mxu1 %v3187_v11 }
 0x134   :  { %v2570_v32 = vpop.f32.mrb[0].mxu0 }
 0x135   :  { %v2576_v33 = vpop.f32.mrb[0].mxu1  ;;  %v3394_v34 = vadd.f32 %v2570_v32, %v2380_v31  ;;  %v242_v35 = vpop.f32.mrb[1].mxu0 }
 0x136   :  { %v3396_v36 = vadd.f32 %v2576_v33, %v2380_v31  ;;  %v262_v37 = vpop.f32.mrb[1].mxu1  ;;  %v3398_v38 = vadd.f32 %v2380_v31, %v242_v35 }
 0x137   :  { %v3400_v39 = vadd.f32 %v2380_v31, %v262_v37  ;;  %v290_v40 = vrot.slane %v3394_v34, 7  ;;  %v775_v43 = vrot.slane %v3394_v34, 1  ;;  %v1013_v23 = vrot.slane %v3394_v34, 2 }
 0x138   :  { %v302_v41 = vrot.slane %v3396_v36, 3  ;;  %v544_v42 = vrot.slane %v3396_v36, 4  ;;  %v2573_v44 = vpop.f32.mrb[2].mxu0  ;;  %v536_v47 = vrot.slane %v3398_v38, 1  ;;  %v774_v49 = vrot.slane %v3398_v38, 2 }
 0x139   :  { %v2579_v45 = vpop.f32.mrb[2].mxu1  ;;  %v299_v46 = vrot.slane %v3400_v39, 4  ;;  %v542_v48 = vrot.slane %v3400_v39, 5  ;;  %v3410_v50 = vadd.f32 %v2573_v44, %v2380_v31  ;;  %v252_v51 = vpop.f32.mrb[3].mxu0  ;;  %v292_v54 = vsel %vm291_vm3, %v290_v40, %v3398_v38 }
 0x13a   :  { %v3412_v52 = vadd.f32 %v2579_v45, %v2380_v31  ;;  %v272_v53 = vpop.f32.mrb[3].mxu1  ;;  %v780_v55 = vrot.slane %v3400_v39, 6  ;;  %v3417_v56 = vadd.f32 %v2380_v31, %v252_v51  ;;  %v537_v58 = vsel %vm291_vm3, %v3394_v34, %v536_v47 }
 0x13b   :  { %v3419_v57 = vadd.f32 %v2380_v31, %v272_v53  ;;  %v776_v59 = vsel %vm291_vm3, %v775_v43, %v774_v49  ;;  %v296_v60 = vrot.slane %v3410_v50, 5  ;;  %v540_v62 = vrot.slane %v3410_v50, 6 }
 0x13c   :  { %v308_v61 = vrot.slane %v3412_v52, 1  ;;  %v548_v63 = vrot.slane %v3412_v52, 2  ;;  %v293_v0 = vrot.slane %v3417_v56, 6  ;;  %v538_v2 = vrot.slane %v3417_v56, 7 }
 0x13d   :  { %v305_v1 = vrot.slane %v3419_v57, 2  ;;  %v546_v3 = vrot.slane %v3419_v57, 3  ;;  %v382_v4 = vpop.f32.mrb[4].mxu1  ;;  %v777_v5 = vsel %vm294_vm4, %v3417_v56, %v776_v59  ;;  %v778_v6 = vrot.slane %v3410_v50, 7 }
 0x13e   :  { %v782_v7 = vrot.slane %v3396_v36, 5  ;;  %v784_v8 = vrot.slane %v3419_v57, 4  ;;  %v295_v9 = vsel %vm294_vm4, %v293_v0, %v292_v54  ;;  %v2590_v10 = vpop.f32.mrb[5].mxu1  ;;  %v539_v13 = vsel %vm294_vm4, %v538_v2, %v537_v58 }
 0x13f   :  { %v786_v14 = vrot.slane %v3412_v52, 3  ;;  %v1012_v15 = vrot.slane %v3398_v38, 3  ;;  %v298_v16 = vsel %vm297_vm5, %v296_v60, %v295_v9  ;;  %v541_v20 = vsel %vm297_vm5, %v540_v62, %v539_v13 }
 0x140   :  { %v779_v21 = vsel %vm297_vm5, %v778_v6, %v777_v5  ;;  %v301_v24 = vsel %vm300_vm6, %v299_v46, %v298_v16  ;;  %v543_v26 = vsel %vm300_vm6, %v542_v48, %v541_v20  ;;  %v1015_v28 = vrot.slane %v3417_v56, 1 }
 0x141   :  { %v781_v27 = vsel %vm300_vm6, %v780_v55, %v779_v21  ;;  %v304_v29 = vsel %vm303_vm7, %v302_v41, %v301_v24  ;;  %v545_v31 = vsel %vm303_vm7, %v544_v42, %v543_v26  ;;  %v1014_v33 = vsel %vm291_vm3, %v1013_v23, %v1012_v15 }
 0x142   :  { %v783_v32 = vsel %vm303_vm7, %v782_v7, %v781_v27  ;;  %v307_v35 = vsel %vm306_vm8, %v305_v1, %v304_v29  ;;  %v547_v37 = vsel %vm306_vm8, %v546_v3, %v545_v31  ;;  %v1016_v43 = vsel %vm294_vm4, %v1015_v28, %v1014_v33 }
 0x143   :  { %v785_v40 = vsel %vm306_vm8, %v784_v8, %v783_v32  ;;  %v310_v44 = vsel %vm309_vm9, %v308_v61, %v307_v35  ;;  %v3459_v45 = vsel %vm309_vm9, %v548_v63, %v547_v37  ;;  %v1017_v42 = vsel %vm297_vm5, %v3410_v50, %v1016_v43 }
 0x144   :  { %v3462_v41 = vsel %vm309_vm9, %v786_v14, %v785_v40  ;;  %v383_v46 = vadd.f32 %v382_v4, %v310_v44  ;;  %v1018_v47 = vrot.slane %v3400_v39, 7  ;;  %v1022_v48 = vrot.slane %v3419_v57, 5 }
 0x145   :  { %v1020_v49 = vrot.slane %v3396_v36, 6  ;;  %v1250_v51 = vrot.slane %v3398_v38, 4  ;;  %v1251_v53 = vrot.slane %v3394_v34, 3  ;;  %v1253_v54 = vrot.slane %v3417_v56, 2 }
 0x146   :  { %v386_v55 = vmax.f32 %v383_v46, 0.0  ;;  %v1019_v58 = vsel %vm300_vm6, %v1018_v47, %v1017_v42  ;;  %v1024_v59 = vrot.slane %v3412_v52, 4  ;;  %v1255_v60 = vrot.slane %v3410_v50, 1 }
 0x147   :  { %v1021_v61 = vsel %vm303_vm7, %v1020_v49, %v1019_v58  ;;  %v1252_v62 = vsel %vm291_vm3, %v1251_v53, %v1250_v51  ;;  %v1258_v63 = vrot.slane %v3396_v36, 7  ;;  %v1260_v0 = vrot.slane %v3419_v57, 6 }
 0x148   :  { %2600 = vmatmul.mubr.msk.f32.vlgmr.msra.gmra.mrb[6].mxu1 %vm312_vm2, %v386_v55  ;;  %v1023_v1 = vsel %vm306_vm8, %v1022_v48, %v1021_v61  ;;  %v1254_v2 = vsel %vm294_vm4, %v1253_v54, %v1252_v62  ;;  %v1488_v3 = vrot.slane %v3398_v38, 5  ;;  %v1489_v4 = vrot.slane %v3394_v34, 4 }
 0x149   :  { %2888 = vmatpush3.bf16.msra.mxu1 %v3336_v12  ;;  %2621 = vmatprep.mubr.msk.f32.mxu1 %vm3188_vm1, %v3189_v18  ;;  %v3488_v5 = vsel %vm309_vm9, %v1024_v59, %v1023_v1  ;;  %v1256_v6 = vsel %vm297_vm5, %v1255_v60, %v1254_v2  ;;  %v1262_v7 = vrot.slane %v3412_v52, 5  ;;  %v1491_v8 = vrot.slane %v3417_v56, 3  ;;  %v120_v1 = vld [vmem:[#allocation8 + $0x10] sm:$0xff]  ;;  %v121_v2 = vld [vmem:[#allocation8 + $0x18] sm:$0xff] }
 0x14a   :  { %2889 = vmatprep.subr.bf16.mxu1 %v3187_v11  ;;  %v1257_v9 = vsel %vm300_vm6, %v3400_v39, %v1256_v6  ;;  %v1490_v10 = vsel %vm291_vm3, %v1489_v4, %v1488_v3  ;;  %v1493_v13 = vrot.slane %v3410_v50, 2  ;;  %v1495_v14 = vrot.slane %v3400_v39, 1 }
 0x14b   :  { %v1259_v15 = vsel %vm303_vm7, %v1258_v63, %v1257_v9  ;;  %v1492_v16 = vsel %vm294_vm4, %v1491_v8, %v1490_v10  ;;  %v1498_v20 = vrot.slane %v3419_v57, 7  ;;  %v1726_v21 = vrot.slane %v3398_v38, 6 }
 0x14c   :  { %v1261_v23 = vsel %vm306_vm8, %v1260_v0, %v1259_v15  ;;  %v1494_v24 = vsel %vm297_vm5, %v1493_v13, %v1492_v16  ;;  %v1727_v26 = vrot.slane %v3394_v34, 5  ;;  %v1729_v27 = vrot.slane %v3417_v56, 4  ;;  %v126_v13 = vld [vmem:[#allocation10] sm:$0x1] }
 0x14d   :  { %2891 = vmatpush3.bf16.msra.mxu1 %v3350_v17  ;;  %v3509_v28 = vsel %vm309_vm9, %v1262_v7, %v1261_v23  ;;  %v1496_v29 = vsel %vm300_vm6, %v1495_v14, %v1494_v24  ;;  %v1500_v31 = vrot.slane %v3412_v52, 6  ;;  %v1731_v35 = vrot.slane %v3410_v50, 3 }
 0x14e   :  { %2898 = vmatprep.subr.bf16.mxu1 %v3187_v11  ;;  %v1497_v32 = vsel %vm303_vm7, %v3396_v36, %v1496_v29  ;;  %v1728_v33 = vsel %vm291_vm3, %v1727_v26, %v1726_v21  ;;  %v1733_v37 = vrot.slane %v3400_v39, 2  ;;  %v1964_v44 = vrot.slane %v3398_v38, 7 }
 0x14f   :  { %v1499_v40 = vsel %vm306_vm8, %v1498_v20, %v1497_v32  ;;  %v1730_v43 = vsel %vm294_vm4, %v1729_v27, %v1728_v33  ;;  %v1965_v42 = vrot.slane %v3394_v34, 6  ;;  %v1735_v48 = vrot.slane %v3396_v36, 1 }
 0x150   :  { %v3524_v46 = vsel %vm309_vm9, %v1500_v31, %v1499_v40  ;;  %v1732_v47 = vsel %vm297_vm5, %v1731_v35, %v1730_v43  ;;  %v1967_v49 = vrot.slane %v3417_v56, 5  ;;  %v1738_v53 = vrot.slane %v3412_v52, 7 }
 0x151   :  { %v1734_v51 = vsel %vm300_vm6, %v1733_v37, %v1732_v47  ;;  %v1966_v54 = vsel %vm291_vm3, %v1965_v42, %v1964_v44  ;;  %v1969_v55 = vrot.slane %v3410_v50, 4  ;;  %v1971_v58 = vrot.slane %v3400_v39, 3 }
 0x152   :  { %v1736_v38 = vsel %vm303_vm7, %v1735_v48, %v1734_v51  ;;  %v1968_v34 = vsel %vm294_vm4, %v1967_v49, %v1966_v54  ;;  %v1975_v59 = vrot.slane %v3419_v57, 1  ;;  %v1973_v61 = vrot.slane %v3396_v36, 2  ;;  %v3558_v36 = vld [vmem:[%s3794_s6] ss:$0 sm:$0xff] }
 0x153   :  { %v1737_v60 = vsel %vm306_vm8, %v3419_v57, %v1736_v38  ;;  %v1970_v56 = vsel %vm297_vm5, %v1969_v55, %v1968_v34  ;;  %v124_v57 = vmul.f32 0.1, %v120_v1  ;;  %v125_v3 = vmul.f32 0.1, %v121_v2 }
 0x154   :  { %v3542_v62 = vsel %vm309_vm9, %v1738_v53, %v1737_v60  ;;  %v1972_v50 = vsel %vm300_vm6, %v1971_v58, %v1970_v56  ;;  %v129_v9 = vlaneseq  ;;  %v127_v14 = vmul.f32 0.1, %v126_v13 }
 0x155   :  { %v1974_v63 = vsel %vm303_vm7, %v1973_v61, %v1972_v50  ;;  %v3551_v4 = vpack.c.bf16 %v125_v3, %v124_v57 }
 0x156   :  { %v1976_v0 = vsel %vm306_vm8, %v1975_v59, %v1974_v63  ;;  %v130_v10 = vshrl.u32 %v129_v9, 7 }
 0x157   :  { %v3549_v39 = vsel %vm309_vm9, %v3412_v52, %v1976_v0  ;;  %2885 = vmatpush3.bf16.msra.mxu0 %v3551_v4 }
 0x158   :  { %2892 = vmatprep.subr.bf16.mxu0 %v3187_v11  ;;  %v131_v15 = vsub.s32 0, %v130_v10 }
 0x15a   :  { %v3568_v16 = vrot.slane %v127_v14, %v131_v15 }
 0x21b   :  { %v456_v6 = vpop.f32.mrb[6].mxu1 }
 0x21c   :  { %v457_v7 = vadd.f32 %v3558_v36, %v456_v6  ;;  %v2601_v52 = vpop.f32.mrb[7].mxu1 }
 0x21e   :  { %v460_v8 = vmax.f32 %v457_v7, 0.0 }
 0x220   :  { %2611 = vmatmul.mubr.msk.f32.vlgmr.msra.gmra.mrb[4].mxu0 %vm312_vm2, %v460_v8 }
 0x221   :  { %2894 = vmatpush3.bf16.msra.mxu0 %v3373_v22  ;;  %2632 = vmatprep.mubr.msk.f32.mxu0 %vm3188_vm1, %v3189_v18 }
 0x222   :  { %2895 = vmatprep.subr.bf16.mxu0 %v3187_v11 }
 0x225   :  { %2897 = vmatpush3.bf16.msra.mxu0 %v3383_v25 }
 0x226   :  { %2904 = vmatprep.subr.bf16.mxu0 %v3187_v11 }
 0x2f3   :  { %v530_v20 = vpop.f32.mrb[4].mxu0 }
 0x2f4   :  { %v534_v21 = vadd.f32 %v530_v20, %v3360_v19  ;;  %v2612_v23 = vpop.f32.mrb[5].mxu0 }
 0x2f6   :  { %v3572_v24 = vadd.f32 %v534_v21, %v3568_v16 }
 0x2f8   :  { %2622 = vmatmul.mubr.msk.f32.vlgmr.msra.gmra.mrb[8].mxu1 %vm312_vm2, %v3572_v24 }
 0x2f9   :  { %2900 = vmatpush3.bf16.msra.mxu1 %v3387_v30  ;;  %2643 = vmatprep.mubr.msk.f32.mxu1 %vm3188_vm1, %v3189_v18 }
 0x2fa   :  { %2901 = vmatprep.subr.bf16.mxu1 %v3187_v11 }
 0x2fd   :  { %2903 = vmatpush3.bf16.msra.mxu1 %v3551_v4 }
 0x2fe   :  { %2910 = vmatprep.subr.bf16.mxu1 %v3187_v11 }
 0x3cb   :  { %v620_v26 = vpop.f32.mrb[8].mxu1 }
 0x3cc   :  { %v621_v19 = vadd.f32 %v620_v26, %v3459_v45  ;;  %v2623_v27 = vpop.f32.mrb[9].mxu1 }
 0x3ce   :  { %v624_v29 = vmax.f32 %v621_v19, 0.0 }
 0x3d0   :  { %2633 = vmatmul.mubr.msk.f32.vlgmr.msra.gmra.mrb[6].mxu0 %vm312_vm2, %v624_v29 }
 0x3d1   :  { %2906 = vmatpush3.bf16.msra.mxu0 %v3336_v12  ;;  %2654 = vmatprep.mubr.msk.f32.mxu0 %vm3188_vm1, %v3189_v18 }
 0x3d2   :  { %2907 = vmatprep.subr.bf16.mxu0 %v3187_v11 }
 0x3d5   :  { %2909 = vmatpush3.bf16.msra.mxu0 %v3350_v17 }
 0x3d6   :  { %2916 = vmatprep.subr.bf16.mxu0 %v3187_v11 }
 0x4a3   :  { %v694_v31 = vpop.f32.mrb[6].mxu0 }
 0x4a4   :  { %v695_v32 = vadd.f32 %v3558_v36, %v694_v31  ;;  %v2634_v33 = vpop.f32.mrb[7].mxu0 }
 0x4a6   :  { %v698_v45 = vmax.f32 %v695_v32, 0.0 }
 0x4a8   :  { %2644 = vmatmul.mubr.msk.f32.vlgmr.msra.gmra.mrb[10].mxu1 %vm312_vm2, %v698_v45 }
 0x4a9   :  { %2912 = vmatpush3.bf16.msra.mxu1 %v3373_v22  ;;  %2665 = vmatprep.mubr.msk.f32.mxu1 %vm3188_vm1, %v3189_v18 }
 0x4aa   :  { %2913 = vmatprep.subr.bf16.mxu1 %v3187_v11 }
 0x4ad   :  { %2915 = vmatpush3.bf16.msra.mxu1 %v3383_v25 }
 0x4ae   :  { %2922 = vmatprep.subr.bf16.mxu1 %v3187_v11 }
 0x57b   :  { %v768_v35 = vpop.f32.mrb[10].mxu1 }
 0x57c   :  { %v772_v37 = vadd.f32 %v768_v35, %v3572_v24  ;;  %v2645_v40 = vpop.f32.mrb[11].mxu1 }
 0x57e   :  { %v3600_v43 = vadd.f32 %v772_v37, %v3568_v16 }
 0x580   :  { %2655 = vmatmul.mubr.msk.f32.vlgmr.msra.gmra.mrb[8].mxu0 %vm312_vm2, %v3600_v43 }
 0x581   :  { %2918 = vmatpush3.bf16.msra.mxu0 %v3387_v30  ;;  %2676 = vmatprep.mubr.msk.f32.mxu0 %vm3188_vm1, %v3189_v18 }
 0x582   :  { %2919 = vmatprep.subr.bf16.mxu0 %v3187_v11 }
 0x585   :  { %2921 = vmatpush3.bf16.msra.mxu0 %v3551_v4 }
 0x586   :  { %2928 = vmatprep.subr.bf16.mxu0 %v3187_v11 }
 0x653   :  { %v858_v44 = vpop.f32.mrb[8].mxu0 }
 0x654   :  { %v859_v42 = vadd.f32 %v858_v44, %v3462_v41  ;;  %v2656_v47 = vpop.f32.mrb[9].mxu0 }
 0x656   :  { %v862_v48 = vmax.f32 %v859_v42, 0.0 }
 0x658   :  { %2666 = vmatmul.mubr.msk.f32.vlgmr.msra.gmra.mrb[12].mxu1 %vm312_vm2, %v862_v48 }
 0x659   :  { %2924 = vmatpush3.bf16.msra.mxu1 %v3336_v12  ;;  %2687 = vmatprep.mubr.msk.f32.mxu1 %vm3188_vm1, %v3189_v18 }
 0x65a   :  { %2925 = vmatprep.subr.bf16.mxu1 %v3187_v11 }
 0x65d   :  { %2927 = vmatpush3.bf16.msra.mxu1 %v3350_v17 }
 0x65e   :  { %2934 = vmatprep.subr.bf16.mxu1 %v3187_v11 }
 0x72b   :  { %v932_v49 = vpop.f32.mrb[12].mxu1 }
 0x72c   :  { %v933_v51 = vadd.f32 %v3558_v36, %v932_v49  ;;  %v2667_v53 = vpop.f32.mrb[13].mxu1 }
 0x72e   :  { %v936_v41 = vmax.f32 %v933_v51, 0.0 }
 0x730   :  { %2677 = vmatmul.mubr.msk.f32.vlgmr.msra.gmra.mrb[10].mxu0 %vm312_vm2, %v936_v41 }
 0x731   :  { %2930 = vmatpush3.bf16.msra.mxu0 %v3373_v22  ;;  %2698 = vmatprep.mubr.msk.f32.mxu0 %vm3188_vm1, %v3189_v18 }
 0x732   :  { %2931 = vmatprep.subr.bf16.mxu0 %v3187_v11 }
 0x735   :  { %2933 = vmatpush3.bf16.msra.mxu0 %v3383_v25 }
 0x736   :  { %2940 = vmatprep.subr.bf16.mxu0 %v3187_v11 }
 0x803   :  { %v1006_v54 = vpop.f32.mrb[10].mxu0 }
 0x804   :  { %v1010_v55 = vadd.f32 %v1006_v54, %v3600_v43  ;;  %v2678_v38 = vpop.f32.mrb[11].mxu0 }
 0x806   :  { %v3628_v34 = vadd.f32 %v1010_v55, %v3568_v16 }
 0x808   :  { %2688 = vmatmul.mubr.msk.f32.vlgmr.msra.gmra.mrb[14].mxu1 %vm312_vm2, %v3628_v34 }
 0x809   :  { %2936 = vmatpush3.bf16.msra.mxu1 %v3387_v30  ;;  %2709 = vmatprep.mubr.msk.f32.mxu1 %vm3188_vm1, %v3189_v18 }
 0x80a   :  { %2937 = vmatprep.subr.bf16.mxu1 %v3187_v11 }
 0x80d   :  { %2939 = vmatpush3.bf16.msra.mxu1 %v3551_v4 }
 0x80e   :  { %2946 = vmatprep.subr.bf16.mxu1 %v3187_v11 }
 0x8db   :  { %v1096_v58 = vpop.f32.mrb[14].mxu1 }
 0x8dc   :  { %v1097_v59 = vadd.f32 %v1096_v58, %v3488_v5  ;;  %v2689_v60 = vpop.f32.mrb[15].mxu1 }
 0x8de   :  { %v1100_v56 = vmax.f32 %v1097_v59, 0.0 }
 0x8e0   :  { %2699 = vmatmul.mubr.msk.f32.vlgmr.msra.gmra.mrb[12].mxu0 %vm312_vm2, %v1100_v56 }
 0x8e1   :  { %2942 = vmatpush3.bf16.msra.mxu0 %v3336_v12  ;;  %2720 = vmatprep.mubr.msk.f32.mxu0 %vm3188_vm1, %v3189_v18 }
 0x8e2   :  { %2943 = vmatprep.subr.bf16.mxu0 %v3187_v11 }
 0x8e5   :  { %2945 = vmatpush3.bf16.msra.mxu0 %v3350_v17 }
 0x8e6   :  { %2952 = vmatprep.subr.bf16.mxu0 %v3187_v11 }
 0x9b3   :  { %v1170_v61 = vpop.f32.mrb[12].mxu0 }
 0x9b4   :  { %v1171_v50 = vadd.f32 %v3558_v36, %v1170_v61  ;;  %v2700_v63 = vpop.f32.mrb[13].mxu0 }
 0x9b6   :  { %v1174_v5 = vmax.f32 %v1171_v50, 0.0 }
 0x9b8   :  { %2710 = vmatmul.mubr.msk.f32.vlgmr.msra.gmra.mrb[16].mxu1 %vm312_vm2, %v1174_v5 }
 0x9b9   :  { %2948 = vmatpush3.bf16.msra.mxu1 %v3373_v22  ;;  %2731 = vmatprep.mubr.msk.f32.mxu1 %vm3188_vm1, %v3189_v18 }
 0x9ba   :  { %2949 = vmatprep.subr.bf16.mxu1 %v3187_v11 }
 0x9bd   :  { %2951 = vmatpush3.bf16.msra.mxu1 %v3383_v25 }
 0x9be   :  { %2958 = vmatprep.subr.bf16.mxu1 %v3187_v11 }
 0xa8b   :  { %v1244_v0 = vpop.f32.mrb[16].mxu1 }
 0xa8c   :  { %v1248_v1 = vadd.f32 %v1244_v0, %v3628_v34  ;;  %v2711_v2 = vpop.f32.mrb[17].mxu1 }
 0xa8e   :  { %v3656_v57 = vadd.f32 %v1248_v1, %v3568_v16 }
 0xa90   :  { %2721 = vmatmul.mubr.msk.f32.vlgmr.msra.gmra.mrb[14].mxu0 %vm312_vm2, %v3656_v57 }
 0xa91   :  { %2954 = vmatpush3.bf16.msra.mxu0 %v3387_v30  ;;  %2742 = vmatprep.mubr.msk.f32.mxu0 %vm3188_vm1, %v3189_v18 }
 0xa92   :  { %2955 = vmatprep.subr.bf16.mxu0 %v3187_v11 }
 0xa95   :  { %2957 = vmatpush3.bf16.msra.mxu0 %v3551_v4 }
 0xa96   :  { %2964 = vmatprep.subr.bf16.mxu0 %v3187_v11 }
 0xb63   :  { %v1334_v3 = vpop.f32.mrb[14].mxu0 }
 0xb64   :  { %v1335_v6 = vadd.f32 %v1334_v3, %v3509_v28  ;;  %v2722_v7 = vpop.f32.mrb[15].mxu0 }
 0xb66   :  { %v1338_v52 = vmax.f32 %v1335_v6, 0.0 }
 0xb68   :  { %2732 = vmatmul.mubr.msk.f32.vlgmr.msra.gmra.mrb[18].mxu1 %vm312_vm2, %v1338_v52 }
 0xb69   :  { %2960 = vmatpush3.bf16.msra.mxu1 %v3336_v12  ;;  %2753 = vmatprep.mubr.msk.f32.mxu1 %vm3188_vm1, %v3189_v18 }
 0xb6a   :  { %2961 = vmatprep.subr.bf16.mxu1 %v3187_v11 }
 0xb6d   :  { %2963 = vmatpush3.bf16.msra.mxu1 %v3350_v17 }
 0xb6e   :  { %2970 = vmatprep.subr.bf16.mxu1 %v3187_v11 }
 0xc3b   :  { %v1408_v8 = vpop.f32.mrb[18].mxu1 }
 0xc3c   :  { %v1409_v9 = vadd.f32 %v3558_v36, %v1408_v8  ;;  %v2733_v10 = vpop.f32.mrb[19].mxu1 }
 0xc3e   :  { %v1412_v28 = vmax.f32 %v1409_v9, 0.0 }
 0xc40   :  { %2743 = vmatmul.mubr.msk.f32.vlgmr.msra.gmra.mrb[16].mxu0 %vm312_vm2, %v1412_v28 }
 0xc41   :  { %2966 = vmatpush3.bf16.msra.mxu0 %v3373_v22  ;;  %2764 = vmatprep.mubr.msk.f32.mxu0 %vm3188_vm1, %v3189_v18 }
 0xc42   :  { %2967 = vmatprep.subr.bf16.mxu0 %v3187_v11 }
 0xc45   :  { %2969 = vmatpush3.bf16.msra.mxu0 %v3383_v25 }
 0xc46   :  { %2976 = vmatprep.subr.bf16.mxu0 %v3187_v11 }
 0xd13   :  { %v1482_v13 = vpop.f32.mrb[16].mxu0 }
 0xd14   :  { %v1486_v14 = vadd.f32 %v1482_v13, %v3656_v57  ;;  %v2744_v15 = vpop.f32.mrb[17].mxu0 }
 0xd16   :  { %v3684_v20 = vadd.f32 %v1486_v14, %v3568_v16 }
 0xd18   :  { %2754 = vmatmul.mubr.msk.f32.vlgmr.msra.gmra.mrb[20].mxu1 %vm312_vm2, %v3684_v20 }
 0xd19   :  { %2972 = vmatpush3.bf16.msra.mxu1 %v3387_v30  ;;  %2775 = vmatprep.mubr.msk.f32.mxu1 %vm3188_vm1, %v3189_v18 }
 0xd1a   :  { %2973 = vmatprep.subr.bf16.mxu1 %v3187_v11 }
 0xd1d   :  { %2975 = vmatpush3.bf16.msra.mxu1 %v3551_v4 }
 0xd1e   :  { %2982 = vmatprep.subr.bf16.mxu1 %v3187_v11 }
 0xdeb   :  { %v1572_v21 = vpop.f32.mrb[20].mxu1 }
 0xdec   :  { %v1573_v23 = vadd.f32 %v1572_v21, %v3524_v46  ;;  %v2755_v26 = vpop.f32.mrb[21].mxu1 }
 0xdee   :  { %v1576_v19 = vmax.f32 %v1573_v23, 0.0 }
 0xdf0   :  { %2765 = vmatmul.mubr.msk.f32.vlgmr.msra.gmra.mrb[18].mxu0 %vm312_vm2, %v1576_v19 }
 0xdf1   :  { %2978 = vmatpush3.bf16.msra.mxu0 %v3336_v12  ;;  %2786 = vmatprep.mubr.msk.f32.mxu0 %vm3188_vm1, %v3189_v18 }
 0xdf2   :  { %2979 = vmatprep.subr.bf16.mxu0 %v3187_v11 }
 0xdf5   :  { %2981 = vmatpush3.bf16.msra.mxu0 %v3350_v17 }
 0xdf6   :  { %2988 = vmatprep.subr.bf16.mxu0 %v3187_v11 }
 0xec3   :  { %v1646_v27 = vpop.f32.mrb[18].mxu0 }
 0xec4   :  { %v1647_v29 = vadd.f32 %v3558_v36, %v1646_v27  ;;  %v2766_v31 = vpop.f32.mrb[19].mxu0 }
 0xec6   :  { %v1650_v46 = vmax.f32 %v1647_v29, 0.0 }
 0xec8   :  { %2776 = vmatmul.mubr.msk.f32.vlgmr.msra.gmra.mrb[22].mxu1 %vm312_vm2, %v1650_v46 }
 0xec9   :  { %2984 = vmatpush3.bf16.msra.mxu1 %v3373_v22  ;;  %2797 = vmatprep.mubr.msk.f32.mxu1 %vm3188_vm1, %v3189_v18 }
 0xeca   :  { %2985 = vmatprep.subr.bf16.mxu1 %v3187_v11 }
 0xecd   :  { %2987 = vmatpush3.bf16.msra.mxu1 %v3383_v25 }
 0xece   :  { %2994 = vmatprep.subr.bf16.mxu1 %v3187_v11 }
 0xf9b   :  { %v1720_v32 = vpop.f32.mrb[22].mxu1 }
 0xf9c   :  { %v1724_v33 = vadd.f32 %v1720_v32, %v3684_v20  ;;  %v2777_v45 = vpop.f32.mrb[23].mxu1 }
 0xf9e   :  { %v1725_v35 = vadd.f32 %v1724_v33, %v3568_v16 }
 0xfa0   :  { %2787 = vmatmul.mubr.msk.f32.vlgmr.msra.gmra.mrb[20].mxu0 %vm312_vm2, %v1725_v35 }
 0xfa1   :  { %2990 = vmatpush3.bf16.msra.mxu0 %v3387_v30  ;;  %2808 = vmatprep.mubr.msk.f32.mxu0 %vm3188_vm1, %v3189_v18 }
 0xfa2   :  { %2991 = vmatprep.subr.bf16.mxu0 %v3187_v11 }
 0xfa5   :  { %2993 = vmatpush3.bf16.msra.mxu0 %v3551_v4 }
 0xfa6   :  { %3000 = vmatprep.subr.bf16.mxu0 %v3187_v11 }
0x1073   :  { %v1810_v37 = vpop.f32.mrb[20].mxu0 }
0x1074   :  { %v1811_v40 = vadd.f32 %v1810_v37, %v3542_v62  ;;  %v2788_v44 = vpop.f32.mrb[21].mxu0 }
0x1076   :  { %v1814_v42 = vmax.f32 %v1811_v40, 0.0 }
0x1078   :  { %2798 = vmatmul.mubr.msk.f32.vlgmr.msra.gmra.mrb[24].mxu1 %vm312_vm2, %v1814_v42 }
0x1079   :  { %2996 = vmatpush3.bf16.msra.mxu1 %v3336_v12  ;;  %2819 = vmatprep.mubr.msk.f32.mxu1 %vm3188_vm1, %v3189_v18 }
0x107a   :  { %2997 = vmatprep.subr.bf16.mxu1 %v3187_v11 }
0x107d   :  { %2999 = vmatpush3.bf16.msra.mxu1 %v3350_v17 }
0x107e   :  { %3006 = vmatprep.subr.bf16.mxu1 %v3187_v11 }
0x114b   :  { %v1884_v47 = vpop.f32.mrb[24].mxu1 }
0x114c   :  { %v1885_v48 = vadd.f32 %v3558_v36, %v1884_v47  ;;  %v2799_v49 = vpop.f32.mrb[25].mxu1 }
0x114e   :  { %v1888_v62 = vmax.f32 %v1885_v48, 0.0 }
0x1150   :  { %2809 = vmatmul.mubr.msk.f32.vlgmr.msra.gmra.mrb[22].mxu0 %vm312_vm2, %v1888_v62 }
0x1151   :  { %3002 = vmatpush3.bf16.msra.mxu0 %v3373_v22  ;;  %2830 = vmatprep.mubr.msk.f32.mxu0 %vm3188_vm1, %v3189_v18  ;;  %v2202_v22 = vld [vmem:[%s3797_s9] sm:$0xff] }
0x1152   :  { %3003 = vmatprep.subr.bf16.mxu0 %v3187_v11 }
0x1155   :  { %3005 = vmatpush3.bf16.msra.mxu0 %v3383_v25  ;;  %v2203_v25 = vld [vmem:[%s3797_s9 + $0x8] sm:$0xff] }
0x1156   :  { %v3012_v41 = vpack.c.bf16 %v2203_v25, %v2202_v22 }
0x1158   :  { %3013 = vmatprep.subr.bf16.mxu0 %v3012_v41 }
0x1223   :  { %v1958_v12 = vpop.f32.mrb[22].mxu0 }
0x1224   :  { %v1962_v17 = vadd.f32 %v1958_v12, %v1725_v35  ;;  %v2810_v51 = vpop.f32.mrb[23].mxu0 }
0x1226   :  { %v1963_v53 = vadd.f32 %v1962_v17, %v3568_v16 }
0x1228   :  { %2820 = vmatmul.mubr.msk.f32.vlgmr.msra.gmra.mrb[26].mxu1 %vm312_vm2, %v1963_v53 }
0x1229   :  { %3008 = vmatpush3.bf16.msra.mxu1 %v3387_v30  ;;  %2841 = vmatprep.mubr.msk.f32.mxu1 %vm3188_vm1, %v3189_v18  ;;  %v2204_v30 = vld [vmem:[%s3797_s9 + $0x10] sm:$0xff] }
0x122a   :  { %3009 = vmatprep.subr.bf16.mxu1 %v3187_v11  ;;  %v2205_v11 = vld [vmem:[%s3797_s9 + $0x18] sm:$0xff] }
0x122b   :  { %v3016_v38 = vpack.c.bf16 %v2205_v11, %v2204_v30 }
0x122d   :  { %3011 = vmatpush3.bf16.msra.mxu1 %v3551_v4 }
0x12fb   :  { %v2048_v54 = vpop.f32.mrb[26].mxu1 }
0x12fc   :  { %v2049_v18 = vadd.f32 %v2048_v54, %v3549_v39  ;;  %v2821_v4 = vpop.f32.mrb[27].mxu1 }
0x12fe   :  { %v2052_v55 = vmax.f32 %v2049_v18, 0.0 }
0x1300   :  { %2831 = vmatmul.mubr.msk.f32.vlgmr.msra.gmra.mrb[24].mxu0 %vm312_vm2, %v2052_v55 }
0x1301   :  { %3015 = vmatpush3.bf16.msra.mxu0 %v3012_v41  ;;  %2852 = vmatprep.mubr.msk.f32.mxu0 %vm312_vm2, %v3572_v24 }
0x1302   :  { %3017 = vmatprep.subr.bf16.mxu0 %v3016_v38 }
0x1305   :  { %3019 = vmatpush3.bf16.msra.mxu0 %v3016_v38 }
0x1308   :  { %2853 = vmatmul.mubr.msk.f32.vlgmr.msra.gmra.mrb[26].mxu0 %vm312_vm2, %v3600_v43  ;;  %v2413_v43 = vld [vmem:[%s3798_s10] ss:$0 sm:$0xff]  ;;  %s3194_s10 = smov 80  }
0x1309   :  { %2855 = vmatprep.mubr.msk.f32.mxu0 %vm312_vm2, %v3628_v34 }
0x130c   :  { %2856 = vmatmul.mubr.msk.f32.gmra.mrb[28].mxu0 %vm312_vm2, %v3656_v57 }
0x130d   :  { %2858 = vmatprep.mubr.msk.f32.mxu0 %vm312_vm2, %v3684_v20 }
0x1310   :  { %2859 = vmatmul.mubr.msk.f32.gmra.mrb[30].mxu0 %vm312_vm2, %v1725_v35 }
0x1311   :  { %2861 = vmatprep.mubr.msk.f32.mxu0 %vm312_vm2, %v1963_v53 }
0x13d3   :  { %v2122_v39 = vpop.f32.mrb[24].mxu0 }
0x13d4   :  { %v2123_v24 = vadd.f32 %v3558_v36, %v2122_v39  ;;  %v2832_v58 = vpop.f32.mrb[25].mxu0 }
0x13d6   :  { %v2126_v59 = vmax.f32 %v2123_v24, 0.0 }
0x13d8   :  { %2842 = vmatmul.mubr.msk.f32.vlgmr.msra.gmra.mrb[28].mxu1 %vm312_vm2, %v2126_v59 }
0x13db   :  { %v2854_v34 = vpop.f32.mrb[26].mxu0 }
0x13dc   :  { %v2288_v60 = vadd.f32 %v2854_v34, %v2413_v43  ;;  %v2282_v56 = vpop.f32.mrb[27].mxu0 }
0x13dd   :  { %v2283_v14 = vadd.f32 %v2413_v43, %v2282_v56 }
0x13de   :  { %2322 = vrot.lane.b32.xlu0 %v2288_v60, %s3190_s8 }
0x13df   :  { %v2857_v61 = vpop.f32.mrb[28].mxu0 }
0x13e0   :  { %v2298_v50 = vadd.f32 %v2857_v61, %v2413_v43  ;;  %v2292_v63 = vpop.f32.mrb[29].mxu0 }
0x13e1   :  { %v2293_v5 = vadd.f32 %v2413_v43, %v2292_v63 }
0x13e2   :  { %2330 = vrot.lane.b32.xlu1 %v2298_v50, %s3191_s17 }
0x13e3   :  { %v2860_v36 = vpop.f32.mrb[30].mxu0  ;;  %2326 = vrot.lane.b32.xlu0 %v2293_v5, %s3192_s20 }
0x13e4   :  { %v2308_v0 = vadd.f32 %v2860_v36, %v2413_v43  ;;  %v2302_v1 = vpop.f32.mrb[31].mxu0 }
0x13e5   :  { %v2303_v2 = vadd.f32 %v2413_v43, %v2302_v1 }
0x13e7   :  { %2334 = vrot.lane.b32.xlu1 %v2303_v2, %s3193_s1  ;;  %2338 = vrot.lane.b32.xlu0 %v2308_v0, %s3194_s10 }
0x1450   :  { %v2323_v28 = vpop.permute.xlu0 %2322 }
0x1451   :  { %v2349_v20 = vsel %vm151_vm0, %v2283_v14, %v2323_v28 }
0x1454   :  { %v2331_v13 = vpop.permute.xlu1 %2330 }
0x1455   :  { %v2327_v15 = vpop.permute.xlu0 %2326 }
0x1456   :  { %v2350_v21 = vsel %vm312_vm2, %v2349_v20, %v2327_v15 }
0x1457   :  { %v2352_v23 = vsel %vm2351_vm10, %v2350_v21, %v2331_v13 }
0x1459   :  { %v2339_v19 = vpop.permute.xlu0 %2338 }
0x14ab   :  { %v2196_v57 = vpop.f32.mrb[28].mxu1 }
0x14ac   :  { %v2200_v3 = vadd.f32 %v2196_v57, %v1963_v53  ;;  %v2843_v6 = vpop.f32.mrb[29].mxu1 }
0x14ae   :  { %v2201_v7 = vadd.f32 %v2200_v3, %v3568_v16  ;;  %v2335_v16 = vpop.permute.xlu1 %2334 }
0x14af   :  { %v2354_v26 = vsel %vm2353_vm11, %v2352_v23, %v2335_v16 }
0x14b0   :  { %2862 = vmatmul.mubr.msk.f32.gmra.mrb[32].mxu0 %vm312_vm2, %v2201_v7  ;;  %v2356_v27 = vsel %vm2355_vm12, %v2354_v26, %v2339_v19 }
0x1583   :  { %v2863_v52 = vpop.f32.mrb[32].mxu0 }
0x1584   :  { %v2318_v8 = vadd.f32 %v2863_v52, %v2413_v43  ;;  %v2312_v9 = vpop.f32.mrb[33].mxu0 }
0x1585   :  { %v2313_v10 = vadd.f32 %v2413_v43, %v2312_v9 }
0x1586   :  { %2346 = vrot.lane.b32.xlu0 %v2318_v8, %s3195_s23 }
0x1587   :  { %2342 = vrot.lane.b32.xlu1 %v2313_v10, %s3196_s24 }
0x15f8   :  { %v2347_v31 = vpop.permute.xlu0 %2346 }
0x15f9   :  { %v2343_v29 = vpop.permute.xlu1 %2342 }
0x15fa   :  { %v2358_v46 = vsel %vm2357_vm13, %v2356_v27, %v2343_v29 }
0x15fb   :  { %v2360_v32 = vsel %vm2359_vm14, %v2358_v46, %v2347_v31 }
0x15fc   :  { %2361 = vst [vmem:[#allocation11] sm:$0xff] %v2360_v32 }
0x15fd   :  { %3161 = shalt.err (!%p3158_p2)
}
0x15fe   :  { %s3162_s13 = scalar_lea.hbm %s3799_s11, 128 }
0x15ff   :  { %p3163_p3 = scmp.ne.s32.totalorder %s3799_s11, %s3162_s13  ;;  %p3166_p4 = scmp.lt.u32.totalorder %s3162_s13, %s3799_s11 }
0x1601   :  { %p3168_p5 = pnand %p3166_p4, %p3163_p3 }
0x1603   :  { %3171 = shalt.err (!%p3168_p5)
}
0x1604   :  { %2371 = dma.vmem_to_hbm [thread:$0]  %s2369_s2, 128, %s3799_s11, [#allocation4]  }
0x1605   :  { %3178 = dma.done.wait [#allocation4], 128  }
0x1606   :  { %3179 = vsyncadd [#allocation4], 4294967168 }
0x1607   :  { %2375 = vsyncpa [#allocation3], 1 }
0x1608   :  { %2376 = vsyncpa [#allocation6], 1 }
0x1609   :  { %2377 = vsyncpa [#allocation9], 1 }
0x160a   :  { %2378 = vsyncpa [#allocation4], 1 }

</bundles_post_ra>
